<compile_context>
chip_gen: v5e
topology: v5e:2x2
jax: 0.10.0
libtpu: 0.0.40
codegen_flags: <defaults>
</compile_context>

<pallas_src>
import functools
import math

import jax
import jax.numpy as jnp
from jax.experimental import pallas as pl
from jax.experimental.pallas import tpu as pltpu

# 48 MiB: leaves headroom on v7x (64 MiB physical per TC), still a raise over
# the 16/32 MiB scoped defaults on v5e/v6e.
_VMEM_LIMIT = 48 * 1024 * 1024


def _layer_norm(x, gamma, beta, eps):
    mu = jnp.mean(x, axis=-1, keepdims=True)
    var = jnp.mean((x - mu) ** 2, axis=-1, keepdims=True)
    return (x - mu) * jax.lax.rsqrt(var + eps) * gamma + beta


# ------------------- kernel 1: fused packed QKV projection -------------------
def qkv_proj_kernel(x_ref, w_ref, b_ref, o_ref):
    # (TL, D) bf16 @ (D, 3D) bf16 -> f32 accumulation, + bias (f32), -> bf16.
    acc = jnp.dot(x_ref[0], w_ref[...], preferred_element_type=jnp.float32)
    o_ref[0] = (acc + b_ref[...]).astype(o_ref.dtype)


# -------- kernel 2: attention + out-proj + FFN + both LayerNorms -------------
def encoder_core_kernel(
    x_ref,     # (1, TL, D)      f32   residual stream (query rows)
    q_ref,     # (1, H, TL, Eh)  bf16
    k_ref,     # (1, H, L,  Eh)  bf16  (grid-invariant over the seq-tile axis)
    v_ref,     # (1, H, L,  Eh)  bf16
    wo_ref,    # (H, D, Eh)      bf16  per-head out-proj weight, contraction last
    bo_ref,    # (1, D) f32
    g1_ref,    # (1, D) f32
    be1_ref,   # (1, D) f32
    w1_ref,    # (D, F) bf16
    b1_ref,    # (1, F) f32
    w2_ref,    # (F, D) bf16
    b2_ref,    # (1, D) f32
    g2_ref,    # (1, D) f32
    be2_ref,   # (1, D) f32
    o_ref,     # (1, TL, D)
    *,
    eps: float,
    scale: float,
):
    x = x_ref[0].astype(jnp.float32)          # (TL, D)
    qh = q_ref[0]                             # (H, TL, Eh) bf16
    kh = k_ref[0]                             # (H, L,  Eh) bf16
    vh = v_ref[0]                             # (H, L,  Eh) bf16

    # Scaled dot-product attention, all heads batched (flash-style einsums).
    s = jnp.einsum('hqe,hke->hqk', qh, kh,
                   preferred_element_type=jnp.float32) * scale        # (H, TL, L)
    s = s - jnp.max(s, axis=-1, keepdims=True)
    p = jnp.exp(s)                                                     # f32 (v5e-safe)
    p = p * pl.reciprocal(jnp.sum(p, axis=-1, keepdims=True), approx=True)

    oh = jnp.einsum('hqk,hke->hqe', p.astype(jnp.bfloat16), vh,
                    preferred_element_type=jnp.float32)                # (H, TL, Eh)

    # Output projection folded per-head, reduced over heads (no concatenate /
    # no in-kernel transpose).
    yh = jnp.einsum('hqe,hde->hqd', oh.astype(jnp.bfloat16), wo_ref[...],
                    preferred_element_type=jnp.float32)                # (H, TL, D)
    attn = jnp.sum(yh, axis=0) + bo_ref[...]                           # (TL, D)

    # Residual + LayerNorm 1 (post-norm).
    y1 = _layer_norm(x + attn, g1_ref[...], be1_ref[...], eps)

    # Feed-forward: linear1 -> ReLU -> linear2 (bf16 matmul inputs, f32 math).
    h1 = jnp.dot(y1.astype(jnp.bfloat16), w1_ref[...],
                 preferred_element_type=jnp.float32) + b1_ref[...]
    h1 = jnp.maximum(h1, 0.0)
    ff = jnp.dot(h1.astype(jnp.bfloat16), w2_ref[...],
                 preferred_element_type=jnp.float32) + b2_ref[...]

    # Residual + LayerNorm 2.
    y2 = _layer_norm(y1 + ff, g2_ref[...], be2_ref[...], eps)
    o_ref[0] = y2.astype(o_ref.dtype)


# ------------------------------- wrapper --------------------------------------
def _const_spec(shape, single_buffer):
    rank = len(shape)
    idx = lambda n, l, _r=rank: (0,) * _r
    if single_buffer:
        # Grid-invariant: DMA'd once; single buffer halves the VMEM footprint.
        return pl.BlockSpec(shape, idx, pipeline_mode=pl.Buffered(1))
    return pl.BlockSpec(shape, idx)


def _forward(x, params, *, nheads, eps, seq_block, single_buffer_weights):
    N, L, D = x.shape
    F = params["w1_t"].shape[1]
    assert D % nheads == 0, "d_model must be divisible by nheads"
    e_head = D // nheads
    TL = seq_block if seq_block is not None else min(L, 256)
    assert L % TL == 0, "seq_block must divide L"

    bf16, f32 = jnp.bfloat16, jnp.float32
    x_bf16 = x.astype(bf16)

    def const(shape):
        return _const_spec(shape, single_buffer_weights)

    # ---- pass 1: fused packed QKV projection (full MXU width N = 3D) -------
    wqkv = params["wqkv_t"].astype(bf16)                 # (D, 3D)
    bqkv = params["bqkv"].reshape(1, 3 * D).astype(f32)  # (1, 3D)

    qkv = pl.pallas_call(
        qkv_proj_kernel,
        out_shape=jax.ShapeDtypeStruct((N, L, 3 * D), bf16),
        grid_spec=pltpu.PrefetchScalarGridSpec(
            num_scalar_prefetch=0,
            grid=(N, L // TL),
            in_specs=[
                pl.BlockSpec((1, TL, D), lambda n, l: (n, l, 0)),
                const((D, 3 * D)),
                const((1, 3 * D)),
            ],
            out_specs=pl.BlockSpec((1, TL, 3 * D), lambda n, l: (n, l, 0)),
        ),
        compiler_params=pltpu.CompilerParams(
            dimension_semantics=("parallel", "parallel"),
            vmem_limit_bytes=_VMEM_LIMIT,
        ),
    )(x_bf16, wqkv, bqkv)

    # Head split is pure-JAX layout plumbing (outside the kernels): bf16.
    q, k, v = jnp.split(qkv, 3, axis=-1)

    def heads(t):                                        # (N, L, D) -> (N, H, L, Eh)
        return t.reshape(N, L, nheads, e_head).transpose(0, 2, 1, 3)

    q_h, k_h, v_h = heads(q), heads(k), heads(v)

    # out_proj: (H*Eh, D) -> (H, D, Eh) with the contraction dim (Eh) last.
    wo_h = jnp.transpose(params["wo_t"].reshape(nheads, e_head, D),
                         (0, 2, 1)).astype(bf16)
    w1 = params["w1_t"].astype(bf16)                     # (D, F)
    w2 = params["w2_t"].astype(bf16)                     # (F, D)

    kernel = functools.partial(encoder_core_kernel, eps=eps,
                               scale=1.0 / math.sqrt(e_head))

    return pl.pallas_call(
        kernel,
        out_shape=jax.ShapeDtypeStruct((N, L, D), x.dtype),
        grid_spec=pltpu.PrefetchScalarGridSpec(
            num_scalar_prefetch=0,
            grid=(N, L // TL),
            in_specs=[
                pl.BlockSpec((1, TL, D), lambda n, l: (n, l, 0)),                 # x rows (f32)
                pl.BlockSpec((1, nheads, TL, e_head), lambda n, l: (n, 0, l, 0)), # q tile
                pl.BlockSpec((1, nheads, L, e_head), lambda n, l: (n, 0, 0, 0)),  # k (full seq)
                pl.BlockSpec((1, nheads, L, e_head), lambda n, l: (n, 0, 0, 0)),  # v (full seq)
                const((nheads, D, e_head)),                                       # wo_h
                const((1, D)),                                                    # bo
                const((1, D)), const((1, D)),                                     # gamma1, beta1
                const((D, F)), const((1, F)),                                     # w1, b1
                const((F, D)), const((1, D)),                                     # w2, b2
                const((1, D)), const((1, D)),                                     # gamma2, beta2
            ],
            out_specs=pl.BlockSpec((1, TL, D), lambda n, l: (n, l, 0)),
        ),
        compiler_params=pltpu.CompilerParams(
            dimension_semantics=("parallel", "parallel"),
            vmem_limit_bytes=_VMEM_LIMIT,
        ),
    )(
        x, q_h, k_h, v_h, wo_h,
        params["bo"], params["gamma1"], params["beta1"],
        w1, params["b1"], w2, params["b2"],
        params["gamma2"], params["beta2"],
    )


def transformer_encoder_layer(x, params, *, nheads, eps=1e-5, seq_block=None):
    """x: (N, L, D) float32; params: dict of pre-transposed (in, out) weights."""
    try:
        return _forward(x, params, nheads=nheads, eps=eps, seq_block=seq_block,
                        single_buffer_weights=True)
    except Exception:
        # pl.Buffered(1) single-buffering unavailable on this jax/libtpu build:
        # fall back to default double-buffered grid-invariant weights.
        return _forward(x, params, nheads=nheads, eps=eps, seq_block=seq_block,
                        single_buffer_weights=False)


# --------------------------- pure-JAX reference ------------------------------
def reference(x, params, *, nheads, eps=1e-5):
    N, L, D = x.shape
    e_head = D // nheads
    qkv = x @ params["wqkv_t"] + params["bqkv"]
    q, k, v = jnp.split(qkv, 3, axis=-1)

    def split_heads(t):
        return t.reshape(N, L, nheads, e_head).transpose(0, 2, 1, 3)

    q, k, v = split_heads(q), split_heads(k), split_heads(v)
    s = jnp.einsum("nhqd,nhkd->nhqk", q, k) / math.sqrt(e_head)
    p = jax.nn.softmax(s, axis=-1)
    a = jnp.einsum("nhqk,nhkd->nhqd", p, v).transpose(0, 2, 1, 3).reshape(N, L, D)
    a = a @ params["wo_t"] + params["bo"]

    def ln(t, g, b):
        mu = jnp.mean(t, axis=-1, keepdims=True)
        var = jnp.mean((t - mu) ** 2, axis=-1, keepdims=True)
        return (t - mu) / jnp.sqrt(var + eps) * g + b

    y1 = ln(x + a, params["gamma1"], params["beta1"])
    ff = jnp.maximum(y1 @ params["w1_t"] + params["b1"], 0.0) @ params["w2_t"] + params["b2"]
    return ln(y1 + ff, params["gamma2"], params["beta2"])


if __name__ == "__main__":
    # Small but lane-aligned shapes: (N, L, d_model) with d_model multiple of 128.
    # seq_block=8 only to exercise the seq-tile grid axis; production default is
    # TL = min(L, 256).
    N, L, D, NHEAD, FF = 2, 16, 128, 4, 256

    key = jax.random.PRNGKey(0)
    keys = jax.random.split(key, 10)

    def w(k, shape, scale=0.05):
        return (scale * jax.random.normal(k, shape)).astype(jnp.float32)

    params = {
        "wqkv_t": w(keys[0], (D, 3 * D)),
        "bqkv":   w(keys[1], (1, 3 * D)),
        "wo_t":   w(keys[2], (D, D)),
        "bo":     w(keys[3], (1, D)),
        "gamma1": jnp.ones((1, D), jnp.float32),
        "beta1":  jnp.zeros((1, D), jnp.float32),
        "w1_t":   w(keys[4], (D, FF)),
        "b1":     w(keys[5], (1, FF)),
        "w2_t":   w(keys[6], (FF, D)),
        "b2":     w(keys[7], (1, D)),
        "gamma2": jnp.ones((1, D), jnp.float32),
        "beta2":  jnp.zeros((1, D), jnp.float32),
    }

    x = jax.random.normal(keys[8], (N, L, D), jnp.float32)

    out = transformer_encoder_layer(x, params, nheads=NHEAD, eps=1e-5, seq_block=8)
    out = jax.block_until_ready(out)

    ref = reference(x, params, nheads=NHEAD, eps=1e-5)
    assert out.shape == (N, L, D)
    # Tolerance accounts for bf16 matmul operands / bf16 QKV activations
    # (f32 accumulation) and the approx softmax reciprocal.
    assert jnp.allclose(out, ref, atol=2e-2, rtol=2e-2), "mismatch vs reference"

    print("KERNEL_OK")
</pallas_src>

<mosaic_0001>
module attributes {stable_mosaic.version = 11 : i64} {
  func.func @qkv_proj_kernel(%arg0: i32, %arg1: i32, %arg2: memref<1x8x128xbf16, #tpu.memory_space<vmem>>, %arg3: memref<128x384xbf16, #tpu.memory_space<vmem>>, %arg4: memref<1x384xf32, #tpu.memory_space<vmem>>, %arg5: memref<1x8x384xbf16, #tpu.memory_space<vmem>>) attributes {dimension_semantics = [#tpu.dimension_semantics<parallel>, #tpu.dimension_semantics<parallel>], iteration_bounds = array<i64: 2, 2>, scalar_prefetch = 0 : i64, scratch_operands = 0 : i64, tpu.core_type = #tpu.core_type<tc>, window_params = [{transform_indices = @transform_0, window_bounds = array<i64: 1, 8, 128>}, {pipeline_mode = #tpu.pipeline_mode<synchronous>, transform_indices = @transform_1, window_bounds = array<i64: 128, 384>}, {pipeline_mode = #tpu.pipeline_mode<synchronous>, transform_indices = @transform_2, window_bounds = array<i64: 1, 384>}, {transform_indices = @transform_3, window_bounds = array<i64: 1, 8, 384>}]} {
    %c0 = arith.constant 0 : index
    %c0_0 = arith.constant 0 : index
    %c0_1 = arith.constant 0 : index
    %0 = vector.load %arg2[%c0, %c0_0, %c0_1] : memref<1x8x128xbf16, #tpu.memory_space<vmem>>, vector<1x8x128xbf16>
    %1 = vector.shape_cast %0 : vector<1x8x128xbf16> to vector<8x128xbf16>
    %c0_2 = arith.constant 0 : index
    %c0_3 = arith.constant 0 : index
    %2 = vector.load %arg3[%c0_2, %c0_3] : memref<128x384xbf16, #tpu.memory_space<vmem>>, vector<128x384xbf16>
    %cst = arith.constant dense<0.000000e+00> : vector<8x384xf32>
    %3 = tpu.matmul %1, %2, %cst {dimension_numbers = #tpu.dot_dimension_numbers<[1], [0], [0], [1], [0, 0, 1, 1], [], []>} : vector<8x128xbf16>, vector<128x384xbf16>, vector<8x384xf32> -> vector<8x384xf32>
    %c0_4 = arith.constant 0 : index
    %c0_5 = arith.constant 0 : index
    %4 = vector.load %arg4[%c0_4, %c0_5] : memref<1x384xf32, #tpu.memory_space<vmem>>, vector<1x384xf32>
    %5 = vector.broadcast %4 : vector<1x384xf32> to vector<8x384xf32>
    %6 = arith.addf %3, %5 : vector<8x384xf32>
    %7 = arith.truncf %6 : vector<8x384xf32> to vector<8x384xbf16>
    %c0_6 = arith.constant 0 : index
    %c0_7 = arith.constant 0 : index
    %c0_8 = arith.constant 0 : index
    %8 = vector.load %arg5[%c0_6, %c0_7, %c0_8] : memref<1x8x384xbf16, #tpu.memory_space<vmem>>, vector<1x8x384xbf16>
    %9 = vector.shape_cast %8 : vector<1x8x384xbf16> to vector<8x384xbf16>
    %10 = vector.shape_cast %7 : vector<8x384xbf16> to vector<1x8x384xbf16>
    tpu.vector_store %arg5[%c0_6, %c0_7, %c0_8], %10 {strides = array<i32>} : memref<1x8x384xbf16, #tpu.memory_space<vmem>>, vector<1x8x384xbf16>,
    return
  }
  func.func @transform_0(%arg0: i32, %arg1: i32) -> (i32, i32, i32) {
    %c0_i32 = arith.constant 0 : i32
    %c0_i32_0 = arith.constant 0 : i32
    return %arg0, %arg1, %c0_i32 : i32, i32, i32
  }
  func.func @transform_1(%arg0: i32, %arg1: i32) -> (i32, i32) {
    %c0_i32 = arith.constant 0 : i32
    %c0_i32_0 = arith.constant 0 : i32
    %c0_i32_1 = arith.constant 0 : i32
    return %c0_i32, %c0_i32_0 : i32, i32
  }
  func.func @transform_2(%arg0: i32, %arg1: i32) -> (i32, i32) {
    %c0_i32 = arith.constant 0 : i32
    %c0_i32_0 = arith.constant 0 : i32
    %c0_i32_1 = arith.constant 0 : i32
    return %c0_i32, %c0_i32_0 : i32, i32
  }
  func.func @transform_3(%arg0: i32, %arg1: i32) -> (i32, i32, i32) {
    %c0_i32 = arith.constant 0 : i32
    %c0_i32_0 = arith.constant 0 : i32
    return %arg0, %arg1, %c0_i32 : i32, i32, i32
  }
}

module attributes {stable_mosaic.version = 11 : i64} {
  func.func @qkv_proj_kernel(%arg0: i32, %arg1: i32, %arg2: memref<1x8x128xbf16, #tpu.memory_space<vmem>>, %arg3: memref<128x384xbf16, #tpu.memory_space<vmem>>, %arg4: memref<1x384xf32, #tpu.memory_space<vmem>>, %arg5: memref<1x8x384xbf16, #tpu.memory_space<vmem>>) attributes {dimension_semantics = [#tpu.dimension_semantics<parallel>, #tpu.dimension_semantics<parallel>], iteration_bounds = array<i64: 2, 2>, scalar_prefetch = 0 : i64, scratch_operands = 0 : i64, tpu.core_type = #tpu.core_type<tc>, window_params = [{transform_indices = @transform_0, window_bounds = array<i64: 1, 8, 128>}, {pipeline_mode = #tpu.pipeline_mode<synchronous>, transform_indices = @transform_1, window_bounds = array<i64: 128, 384>}, {pipeline_mode = #tpu.pipeline_mode<synchronous>, transform_indices = @transform_2, window_bounds = array<i64: 1, 384>}, {transform_indices = @transform_3, window_bounds = array<i64: 1, 8, 384>}]} {
    %c0 = arith.constant 0 : index
    %c0_0 = arith.constant 0 : index
    %c0_1 = arith.constant 0 : index
    %0 = vector.load %arg2[%c0, %c0_0, %c0_1] : memref<1x8x128xbf16, #tpu.memory_space<vmem>>, vector<1x8x128xbf16>
    %1 = vector.shape_cast %0 : vector<1x8x128xbf16> to vector<8x128xbf16>
    %c0_2 = arith.constant 0 : index
    %c0_3 = arith.constant 0 : index
    %2 = vector.load %arg3[%c0_2, %c0_3] : memref<128x384xbf16, #tpu.memory_space<vmem>>, vector<128x384xbf16>
    %cst = arith.constant dense<0.000000e+00> : vector<8x384xf32>
    %3 = tpu.matmul %1, %2, %cst {dimension_numbers = #tpu.dot_dimension_numbers<[1], [0], [0], [1], [0, 0, 1, 1], [], []>} : vector<8x128xbf16>, vector<128x384xbf16>, vector<8x384xf32> -> vector<8x384xf32>
    %c0_4 = arith.constant 0 : index
    %c0_5 = arith.constant 0 : index
    %4 = vector.load %arg4[%c0_4, %c0_5] : memref<1x384xf32, #tpu.memory_space<vmem>>, vector<1x384xf32>
    %5 = vector.broadcast %4 : vector<1x384xf32> to vector<8x384xf32>
    %6 = arith.addf %3, %5 : vector<8x384xf32>
    %7 = arith.truncf %6 : vector<8x384xf32> to vector<8x384xbf16>
    %c0_6 = arith.constant 0 : index
    %c0_7 = arith.constant 0 : index
    %c0_8 = arith.constant 0 : index
    %8 = vector.load %arg5[%c0_6, %c0_7, %c0_8] : memref<1x8x384xbf16, #tpu.memory_space<vmem>>, vector<1x8x384xbf16>
    %9 = vector.shape_cast %8 : vector<1x8x384xbf16> to vector<8x384xbf16>
    %10 = vector.shape_cast %7 : vector<8x384xbf16> to vector<1x8x384xbf16>
    tpu.vector_store %arg5[%c0_6, %c0_7, %c0_8], %10 {strides = array<i32>} : memref<1x8x384xbf16, #tpu.memory_space<vmem>>, vector<1x8x384xbf16>,
    return
  }
  func.func @transform_0(%arg0: i32, %arg1: i32) -> (i32, i32, i32) {
    %c0_i32 = arith.constant 0 : i32
    %c0_i32_0 = arith.constant 0 : i32
    return %arg0, %arg1, %c0_i32 : i32, i32, i32
  }
  func.func @transform_1(%arg0: i32, %arg1: i32) -> (i32, i32) {
    %c0_i32 = arith.constant 0 : i32
    %c0_i32_0 = arith.constant 0 : i32
    %c0_i32_1 = arith.constant 0 : i32
    return %c0_i32, %c0_i32_0 : i32, i32
  }
  func.func @transform_2(%arg0: i32, %arg1: i32) -> (i32, i32) {
    %c0_i32 = arith.constant 0 : i32
    %c0_i32_0 = arith.constant 0 : i32
    %c0_i32_1 = arith.constant 0 : i32
    return %c0_i32, %c0_i32_0 : i32, i32
  }
  func.func @transform_3(%arg0: i32, %arg1: i32) -> (i32, i32, i32) {
    %c0_i32 = arith.constant 0 : i32
    %c0_i32_0 = arith.constant 0 : i32
    return %arg0, %arg1, %c0_i32 : i32, i32, i32
  }
}

</mosaic_0001>

<bundles_post_ra>
// kernel: tpu_custom_call.1
= control target key start
LH: loop header
LB: loop body
LE: loop exit
PB: predicated region body
PF: predicated region fallthrough
CT: control target
= control target key end

     0   :  { %s1209_s0 = inlined_call_operand.hbm [shape: bf16[2,16,128], index: 0, kind: input, shape index: {}]   ;;  %s1210_s1 = inlined_call_operand.hbm [shape: bf16[128,384], index: 1, kind: input, shape index: {}]   ;;  %s1211_s2 = inlined_call_operand.hbm [shape: f32[1,384], index: 2, kind: input, shape index: {}]   ;;  %s1212_s3 = inlined_call_operand.hbm [shape: bf16[2,16,384], index: 3, kind: output, shape index: {}]  }
   0x1   :  { %1215 = sst [smem:[#allocation14_spill]] %s1210_s1 }
   0x2   :  { %1216 = sst [smem:[#allocation15_spill]] %s1211_s2 }
   0x3   :  { %8 = vsyncpa [#allocation3], 0 }
   0x4   :  { %10 = vsyncpa [#allocation3 + $0x1], 0 }
   0x5   :  { %11 = vsyncpa [#allocation6], 0 }
   0x6   :  { %12 = vsyncpa [#allocation4], 0 }
   0x7   :  { %14 = vsyncpa [#allocation4 + $0x1], 0  ;;  %s1031_s12 = smov 0   ;;  %s1033_s13 = smov 0  }
   0x8   :  { %s1035_s14 = smov 0   ;;  %s1037_s15 = smov 0  }
   0x9   :  { %s1039_s16 = smov 0   ;;  %s1041_s17 = smov 0  }
   0xa   :  { %s1043_s18 = smov 0   ;;  %s1045_s19 = smov 0  }
   0xb LB: > { %s573_s20 = sadd.s32 4294967295, %s1005_s19   ;;  %p575_p0 = scmp.ge.s32.totalorder %s1005_s19, 1  ;;  %s1005_s19 = sphi %s1045_s19, %s20_s19   ;;  %s1001_s18 = sphi %s1043_s18, %s1235_s18   ;;  %s997_s17 = sphi %s1041_s17, %s1234_s17   ;;  %s993_s16 = sphi %s1039_s16, %s1233_s16   ;;  %s989_s15 = sphi %s1037_s15, %s1232_s15   ;;  %s985_s14 = sphi %s1035_s14, %s1231_s14   ;;  %s981_s13 = sphi %s1033_s13, %s1230_s13   ;;  %s977_s12 = sphi %s1031_s12, %s1229_s12  }
   0xc   : > { %p1075_p1 = scmp.eq.s32.totalorder %s573_s20, 0  ;;  %p135_p2 = scmp.lt.s32.totalorder %s1005_s19, 5 }
   0xd   : > { %s1218_s1 = sld [smem:[#allocation14_spill]]  ;;  %s1007_s26 = smov [#allocation5]  }
   0xe   : > { %p1083_p3 = pnand %p575_p0, %p135_p2  ;;  %s148_s27 = sshll.u32 %s1007_s26, 4  ;;  %s149_s27 = int_to_ptr.vmem [resolvable:$true] %s148_s27 }
   0xf   : > { %s1220_s2 = sld [smem:[#allocation15_spill]]  ;;  %s1008_s4 = smov 192  }
  0x10   : > { %p724_p4 = pneg %p1083_p3  ;;  %s1009_s5 = smov 12  }
  0x11   : > { %s1010_s6 = smov [#allocation7]   ;;  %s574_s8 = sadd.s32 4294967294, %s1005_s19  }
  0x12   : > { %p725_p5 = pnand %p724_p4, %p1075_p1  ;;  %s163_s7 = sshll.u32 %s1010_s6, 4  ;;  %s164_s7 = int_to_ptr.vmem [resolvable:$true] %s163_s7 }
  0x13   : > { %s146_s24 = sshll.u32 %s1218_s1, 4  ;;  %s29_s9 = sadd.s32 1, %s997_s17  ;;  %s147_s24 = int_to_ptr.hbm [resolvable:$true] %s146_s24 }
  0x14   : > { %727 = dma.hbm_to_vmem [thread:$0]  (!%p725_p5), %s147_s24, 3072, %s149_s27, [#allocation6], %s1008_s4, %s1008_s4, %s1009_s5  }
  0x15   : > { %s161_s30 = sshll.u32 %s1220_s2, 4  ;;  %p30_p6 = scmp.ge.s32.totalorder %s29_s9, 2  ;;  %s162_s30 = int_to_ptr.hbm [resolvable:$true] %s161_s30 }
  0x16   : > { %730 = dma.hbm_to_vmem [thread:$0]  (!%p725_p5), %s162_s30, 48, %s164_s7, [#allocation6]  }
  0x17   : > { %s32_s10 = sadd.s32 1, %s1001_s18  ;;  %s41_s11 = sadd.s32 1, %s985_s14 }
  0x18   : > { %p48_p7 = scmp.ne.s32.totalorder %s985_s14, %s981_s13  ;;  %s1237_s9 = smov (%p30_p6, %s29_s9), 0 }
  0x19   : > { %1221 = sst [smem:[#allocation12_spill]] %s1237_s9  ;;  %s1239_s10 = smov (!%p30_p6, %s32_s10), %s1001_s18 }
  0x1a   : > { %s37_s22 = ssub.s32 %s997_s17, %s1237_s9  ;;  %p49_p8 = scmp.eq.s32.totalorder %s1005_s19, 0 }
  0x1b   : > { %p34_p9 = scmp.ge.s32.totalorder %s1239_s10, 2  ;;  %p54_p10 = scmp.ne.s32.totalorder %s981_s13, %s977_s12 }
  0x1c   : > { %p1108_p11 = por %p49_p8, %p48_p7  ;;  %p122_p12 = scmp.eq.s32.totalorder %s573_s20, 3 }
  0x1d   : > { %s1241_s10 = smov (%p34_p9, %s1239_s10), 0  ;;  %p1118_p13 = por %p1075_p1, %p54_p10 }
  0x1e   : > { %1223 = sst [smem:[#allocation13_spill]] %s1241_s10  ;;  %p1122_p0 = por %p122_p12, %p48_p7 }
  0x1f   : > { %s36_s27 = ssub.s32 %s1001_s18, %s1241_s10  ;;  %p128_p2 = scmp.eq.s32.totalorder %s574_s8, 3 }
  0x20   : > { %s38_s28 = sor.u32 %s37_s22, %s36_s27  ;;  %p741_p4 = scmp.lt.s32.totalorder %s1005_s19, 4 }
  0x21   : > { %p39_p5 = scmp.eq.s32.totalorder %s38_s28, 0  ;;  %p1129_p6 = por %p128_p2, %p54_p10 }
  0x22   : > { %s174_s29 = sand.u32 1, %s985_s14   ;;  %s580_s30 = sshll.u32 %s1001_s18, 1 }
  0x23   : > { %s1136_s4 = scalar_select %p39_p5, %s985_s14, %s41_s11  }
  0x24   : > { %s579_s5 = sshll.u32 %s174_s29, 2  ;;  %s182_s6 = sadd.s32 %s997_s17, %s580_s30 }
  0x25   : > { %s581_s7 = sshll.u32 %s182_s6, 2  ;;  %s178_s1 = scalar_lea.vmem [#allocation2], %s579_s5 }
  0x26   : > { %s188_s2 = sshll.u32 %s178_s1, 4  ;;  %s184_s9 = scalar_lea.hbm %s1209_s0, %s581_s7  ;;  %s189_s2 = int_to_ptr.vmem [resolvable:$true] %s188_s2 }
  0x27   : > { %s186_s22 = sshll.u32 %s184_s9, 4  ;;  %p732_p7 = pnand %p741_p4, %p1108_p11  ;;  %s187_s22 = int_to_ptr.hbm [resolvable:$true] %s186_s22 }
  0x28   : > { %s175_s27 = scalar_lea.sflag [#allocation3], %s174_s29  ;;  %197 = sbr.rel (%p1083_p3) target bundleno = 224 (0xe0), region = 32 }
  0x29   : > { %734 = dma.hbm_to_vmem [thread:$0]  (!%p732_p7), %s187_s22, 64, %s189_s2, %s175_s27  }
  0x2a   : > { %s1149_s11 = sand.u32 (!%p1083_p3), 1, %s981_s13  }
  0x2b   : > { %s583_s1 = sshll.u32 (!%p1083_p3), %s1149_s11, 2  ;;  %s200_s10 = scalar_lea.sflag (!%p1083_p3), [#allocation3], %s1149_s11 }
  0x2c   : > { %s1153_s28 = scalar_lea.vmem (!%p1083_p3), [#allocation2], %s583_s1 }
  0x2d   : > { %964 = dma.done.wait (%p1118_p13), %s200_s10, 64  }
  0x2e   : > { %966 = vsyncadd (%p1118_p13), %s200_s10, 4294967232 }
  0x2f   : > { %968 = dma.done.wait (%p1075_p1), [#allocation6], 3120  }
  0x30   : > { %970 = vsyncadd (%p1075_p1), [#allocation6], 4294964176  ;;  %v672_v0 = vld [vmem:[#allocation5 + $0xa8] sm:$0xf]  ;;  %v707_v1 = vld [vmem:[#allocation5 + $0xb0] sm:$0xf0] }
  0x31   : > { %v706_v2 = vld [vmem:[#allocation5 + $0xac] sm:$0xf]  ;;  %v673_v3 = vor.u32 %v707_v1, %v672_v0  ;;  %v674_v4 = vld [vmem:[#allocation5 + $0xb4] sm:$0xf0]  ;;  %v680_v5 = vld [vmem:[#allocation5 + $0xb0] sm:$0xf] }
  0x32   : > { %v708_v6 = vld [vmem:[#allocation5 + $0xb8] sm:$0xf0]  ;;  %v677_v7 = vor.u32 %v706_v2, %v674_v4  ;;  %v660_v9 = vld [vmem:[#allocation5 + $0x90] sm:$0xf]  ;;  %v703_v11 = vld [vmem:[#allocation5 + $0x94] sm:$0xf] }
  0x33   : > { %v681_v8 = vor.u32 %v708_v6, %v680_v5  ;;  %v704_v10 = vld [vmem:[#allocation5 + $0x98] sm:$0xf0]  ;;  %406 = vmatpush.bf16.msra.mxu0 %v673_v3  ;;  %v662_v13 = vld [vmem:[#allocation5 + $0x9c] sm:$0xf0]  ;;  %v668_v14 = vld [vmem:[#allocation5 + $0x98] sm:$0xf] }
  0x34   : > { %v661_v12 = vor.u32 %v704_v10, %v660_v9  ;;  %v705_v15 = vld [vmem:[#allocation5 + $0xa0] sm:$0xf0]  ;;  %419 = vmatpush.bf16.msra.mxu1 %v677_v7  ;;  %v665_v16 = vor.u32 %v703_v11, %v662_v13  ;;  %v648_v18 = vld [vmem:[#allocation5 + $0x78] sm:$0xf]  ;;  %v700_v20 = vld [vmem:[#allocation5 + $0x7c] sm:$0xf] }
  0x35   : > { %432 = vmatpush.bf16.msra.mxu2 %v681_v8  ;;  %v669_v17 = vor.u32 %v705_v15, %v668_v14  ;;  %v701_v19 = vld [vmem:[#allocation5 + $0x80] sm:$0xf0]  ;;  %v650_v21 = vld [vmem:[#allocation5 + $0x84] sm:$0xf0]  ;;  %v656_v22 = vld [vmem:[#allocation5 + $0x80] sm:$0xf] }
  0x36   : > { %v702_v23 = vld [vmem:[#allocation5 + $0x88] sm:$0xf0]  ;;  %v649_v24 = vor.u32 %v701_v19, %v648_v18  ;;  %v653_v25 = vor.u32 %v700_v20, %v650_v21  ;;  %v636_v27 = vld [vmem:[#allocation5 + $0x60] sm:$0xf]  ;;  %v697_v29 = vld [vmem:[#allocation5 + $0x64] sm:$0xf] }
  0x37   : > { %407 = vmatpush.bf16.msra.mxu0 %v661_v12  ;;  %v657_v26 = vor.u32 %v702_v23, %v656_v22  ;;  %v698_v28 = vld [vmem:[#allocation5 + $0x68] sm:$0xf0]  ;;  %v638_v30 = vld [vmem:[#allocation5 + $0x6c] sm:$0xf0]  ;;  %v644_v31 = vld [vmem:[#allocation5 + $0x68] sm:$0xf] }
  0x38   : > { %420 = vmatpush.bf16.msra.mxu1 %v665_v16  ;;  %v699_v32 = vld [vmem:[#allocation5 + $0x70] sm:$0xf0]  ;;  %v637_v33 = vor.u32 %v698_v28, %v636_v27  ;;  %v641_v34 = vor.u32 %v697_v29, %v638_v30  ;;  %v624_v36 = vld [vmem:[#allocation5 + $0x48] sm:$0xf]  ;;  %v694_v38 = vld [vmem:[#allocation5 + $0x4c] sm:$0xf] }
  0x39   : > { %433 = vmatpush.bf16.msra.mxu2 %v669_v17  ;;  %v645_v35 = vor.u32 %v699_v32, %v644_v31  ;;  %v695_v37 = vld [vmem:[#allocation5 + $0x50] sm:$0xf0]  ;;  %v626_v39 = vld [vmem:[#allocation5 + $0x54] sm:$0xf0]  ;;  %v632_v40 = vld [vmem:[#allocation5 + $0x50] sm:$0xf] }
  0x3a   : > { %v696_v41 = vld [vmem:[#allocation5 + $0x58] sm:$0xf0]  ;;  %v625_v42 = vor.u32 %v695_v37, %v624_v36  ;;  %v629_v43 = vor.u32 %v694_v38, %v626_v39  ;;  %v612_v45 = vld [vmem:[#allocation5 + $0x30] sm:$0xf]  ;;  %v691_v47 = vld [vmem:[#allocation5 + $0x34] sm:$0xf] }
  0x3b   : > { %408 = vmatpush.bf16.msra.mxu0 %v649_v24  ;;  %v633_v44 = vor.u32 %v696_v41, %v632_v40  ;;  %v692_v46 = vld [vmem:[#allocation5 + $0x38] sm:$0xf0]  ;;  %v614_v48 = vld [vmem:[#allocation5 + $0x3c] sm:$0xf0]  ;;  %v620_v49 = vld [vmem:[#allocation5 + $0x38] sm:$0xf] }
  0x3c   : > { %421 = vmatpush.bf16.msra.mxu1 %v653_v25  ;;  %v693_v50 = vld [vmem:[#allocation5 + $0x40] sm:$0xf0]  ;;  %v613_v51 = vor.u32 %v692_v46, %v612_v45  ;;  %v617_v52 = vor.u32 %v691_v47, %v614_v48  ;;  %v600_v54 = vld [vmem:[#allocation5 + $0x18] sm:$0xf]  ;;  %v688_v56 = vld [vmem:[#allocation5 + $0x1c] sm:$0xf] }
  0x3d   : > { %434 = vmatpush.bf16.msra.mxu2 %v657_v26  ;;  %v621_v53 = vor.u32 %v693_v50, %v620_v49  ;;  %v689_v55 = vld [vmem:[#allocation5 + $0x20] sm:$0xf0]  ;;  %v602_v57 = vld [vmem:[#allocation5 + $0x24] sm:$0xf0]  ;;  %v608_v58 = vld [vmem:[#allocation5 + $0x20] sm:$0xf] }
  0x3e   : > { %v690_v59 = vld [vmem:[#allocation5 + $0x28] sm:$0xf0]  ;;  %v601_v60 = vor.u32 %v689_v55, %v600_v54  ;;  %v605_v61 = vor.u32 %v688_v56, %v602_v57  ;;  %v588_v63 = vld [vmem:[#allocation5] sm:$0xf]  ;;  %v685_v1 = vld [vmem:[#allocation5 + $0x4] sm:$0xf] }
  0x3f   : > { %409 = vmatpush.bf16.msra.mxu0 %v637_v33  ;;  %v609_v62 = vor.u32 %v690_v59, %v608_v58  ;;  %v686_v0 = vld [vmem:[#allocation5 + $0x8] sm:$0xf0]  ;;  %v590_v2 = vld [vmem:[#allocation5 + $0xc] sm:$0xf0]  ;;  %v596_v3 = vld [vmem:[#allocation5 + $0x8] sm:$0xf] }
  0x40   : > { %422 = vmatpush.bf16.msra.mxu1 %v641_v34  ;;  %v687_v4 = vld [vmem:[#allocation5 + $0x10] sm:$0xf0]  ;;  %v589_v5 = vor.u32 %v686_v0, %v588_v63  ;;  %v593_v6 = vor.u32 %v685_v1, %v590_v2  ;;  %v237_v8 = vld [vmem:[%s1153_s28] sm:$0xf]  ;;  %s710_s2 = smul.u32 3, %s989_s15  ;;  %s450_s6 = scalar_lea.sflag [#allocation4], %s1149_s11 }
  0x41   : > { %435 = vmatpush.bf16.msra.mxu2 %v645_v35  ;;  %v597_v7 = vor.u32 %v687_v4, %v596_v3  ;;  %v270_v9 = vld [vmem:[#allocation7] sm:$0x7]  ;;  %s711_s21 = smul.u32 6, %s993_s16  ;;  %s923_s1 = scalar_lea.hbm %s1212_s3, 48 }
  0x42   : > { %v272_v10 = vperm.slane %v270_v9, 0  ;;  %v273_v11 = vperm.slane %v270_v9, 1  ;;  %s709_s9 = smul.u32 12, %s1149_s11  ;;  %v274_v17 = vperm.slane %v270_v9, 2 }
  0x43   : > { %410 = vmatpush.bf16.msra.mxu0 %v625_v42  ;;  %s461_s25 = sadd.s32 %s711_s21, %s710_s2 }
  0x44   : > { %423 = vmatpush.bf16.msra.mxu1 %v629_v43  ;;  %s682_s23 = sshll.u32 %s461_s25, 2  ;;  %s236_s5 = scalar_lea.vmem [#allocation8], %s709_s9 }
  0x45   : > { %436 = vmatpush.bf16.msra.mxu2 %v633_v44  ;;  %s463_s30 = scalar_lea.hbm %s1212_s3, %s682_s23  ;;  %s465_s15 = sshll.u32 %s236_s5, 4  ;;  %s466_s15 = int_to_ptr.vmem [resolvable:$true] %s465_s15 }
  0x46   : > { %s467_s16 = sshll.u32 %s463_s30, 4  ;;  %s468_s16 = int_to_ptr.hbm [resolvable:$true] %s467_s16 }
  0x47   : > { %411 = vmatpush.bf16.msra.mxu0 %v613_v51  ;;  %s917_s7 = sshra.s32 %s468_s16, 4  ;;  %s918_s7 = int_to_ptr.hbm [resolvable:$true] %s917_s7 }
  0x48   : > { %424 = vmatpush.bf16.msra.mxu1 %v617_v52  ;;  %s919_s8 = scalar_lea.hbm %s918_s7, 12  ;;  %p924_p9 = scmp.lt.s32.totalorder %s918_s7, %s1212_s3 }
  0x49   : > { %437 = vmatpush.bf16.msra.mxu2 %v621_v53  ;;  %p920_p1 = scmp.ne.s32.totalorder %s918_s7, %s919_s8  ;;  %p925_p10 = scmp.lt.s32.totalorder %s923_s1, %s919_s8 }
  0x4b   : > { %412 = vmatpush.bf16.msra.mxu0 %v601_v60  ;;  %p921_p3 = pnand %p920_p1, %p1122_p0  ;;  %p926_p11 = por %p925_p10, %p924_p9 }
  0x4c   : > { %425 = vmatpush.bf16.msra.mxu1 %v605_v61 }
  0x4d   : > { %438 = vmatpush.bf16.msra.mxu2 %v609_v62  ;;  %p922_p8 = pneg %p921_p3 }
  0x4f   : > { %413 = vmatpush.bf16.msra.mxu0 %v589_v5  ;;  %p927_p12 = pnand %p926_p11, %p922_p8 }
  0x50   : > { %426 = vmatpush.bf16.msra.mxu1 %v593_v6 }
  0x51   : > { %439 = vmatpush.bf16.msra.mxu2 %v597_v7 }
  0x52   : > { %414 = vmatmul.bf16.vlgmr.msra.gmra.mxu0 %v237_v8 }
  0x53   : > { %427 = vmatmul.bf16.vlgmr.msra.gmra.mxu1 %v237_v8 }
  0x54   : > { %440 = vmatmul.bf16.vlgmr.msra.gmra.mxu2 %v237_v8 }
  0xcf   : > { %v415_v12 = vpop.f32.mrf.mxu0 }
  0xd0   : > { %v416_v13 = vadd.f32 %v415_v12, %v272_v10  ;;  %v428_v14 = vpop.f32.mrf.mxu1 }
  0xd1   : > { %v429_v15 = vadd.f32 %v428_v14, %v273_v11 }
  0xd3   : > { %v445_v16 = vpack.c.bf16 %v429_v15, %v416_v13 }
  0xd5   : > { %447 = vst [vmem:[%s236_s5] sm:$0xff] %v445_v16 }
  0xd7   : > { %v441_v18 = vpop.f32.mrf.mxu2  ;;  %v417_v20 = vpop.f32.mrf.mxu0 }
  0xd8   : > { %v442_v19 = vadd.f32 %v441_v18, %v274_v17  ;;  %v430_v21 = vpop.f32.mrf.mxu1 }
  0xda   : > { %v446_v22 = vpack.c.bf16 %v442_v19, %v442_v19 }
  0xdc   : > { %448 = vst [vmem:[%s236_s5 + $0x8] sm:$0xf] %v446_v22 }
  0xdd   : > { %930 = shalt.err (!%p927_p12)
}
  0xde   : > { %722 = dma.vmem_to_hbm [thread:$0]  (%p1122_p0), %s466_s15, 192, %s468_s16, %s450_s6  }
  0xdf   : > { %v443_v23 = vpop.f32.mrf.mxu2 }
  0xe0 PF: > { %p744_p13 = scmp.ge.s32.totalorder %s1005_s19, 2  ;;  %s479_s11 = sand.u32 1, %s977_s12  }
  0xe1   : > { %s480_s2 = scalar_lea.sflag [#allocation4], %s479_s11 }
  0xe2   : > { %p736_p2 = pnand %p744_p13, %p1129_p6 }
  0xe4   : > { %p737_p4 = pneg %p736_p2 }
  0xe6   : > { %972 = dma.done.wait (%p737_p4), %s480_s2, 192  }
  0xe7   : > { %974 = vsyncadd (%p737_p4), %s480_s2, 4294967104  ;;  %s20_s19 = sadd.s32 1, %s1005_s19   ;;  %s1227_s26 = sld [smem:[#allocation12_spill]] }
  0xe8   : > { %p17_p5 = scmp.ge.s32.totalorder %s20_s19, 6   ;;  %s1228_s21 = sld [smem:[#allocation13_spill]] }
  0xe9   : > { %s1229_s12 = smov %s981_s13  ;;  %s1230_s13 = smov %s985_s14 }
  0xea   : > { %s1231_s14 = smov %s1136_s4  ;;  %s1232_s15 = smov %s997_s17 }
  0xeb   : > { %s1233_s16 = smov %s1001_s18  ;;  %19 = sbr.rel (!%p17_p5) target bundleno = 11 (0xb), region = 85 }
  0xed   : > { %s1234_s17 = smov %s1227_s26 }
  0xee   : > { %s1235_s18 = smov %s1228_s21 }
  0xf0   :  { %486 = vsyncpa [#allocation3], 1 }
  0xf1   :  { %488 = vsyncpa [#allocation3 + $0x1], 1 }
  0xf2   :  { %489 = vsyncpa [#allocation6], 1 }
  0xf3   :  { %490 = vsyncpa [#allocation4], 1 }
  0xf4   :  { %492 = vsyncpa [#allocation4 + $0x1], 1 }

// kernel: tpu_custom_call.1
= control target key start
LH: loop header
LB: loop body
LE: loop exit
PB: predicated region body
PF: predicated region fallthrough
CT: control target
= control target key end

     0   :  { %s1209_s0 = inlined_call_operand.hbm [shape: bf16[2,16,128], index: 0, kind: input, shape index: {}]   ;;  %s1210_s1 = inlined_call_operand.hbm [shape: bf16[128,384], index: 1, kind: input, shape index: {}]   ;;  %s1211_s2 = inlined_call_operand.hbm [shape: f32[1,384], index: 2, kind: input, shape index: {}]   ;;  %s1212_s3 = inlined_call_operand.hbm [shape: bf16[2,16,384], index: 3, kind: output, shape index: {}]  }
   0x1   :  { %1215 = sst [smem:[#allocation14_spill]] %s1210_s1 }
   0x2   :  { %1216 = sst [smem:[#allocation15_spill]] %s1211_s2 }
   0x3   :  { %8 = vsyncpa [#allocation3], 0 }
   0x4   :  { %10 = vsyncpa [#allocation3 + $0x1], 0 }
   0x5   :  { %11 = vsyncpa [#allocation6], 0 }
   0x6   :  { %12 = vsyncpa [#allocation4], 0 }
   0x7   :  { %14 = vsyncpa [#allocation4 + $0x1], 0  ;;  %s1031_s12 = smov 0   ;;  %s1033_s13 = smov 0  }
   0x8   :  { %s1035_s14 = smov 0   ;;  %s1037_s15 = smov 0  }
   0x9   :  { %s1039_s16 = smov 0   ;;  %s1041_s17 = smov 0  }
   0xa   :  { %s1043_s18 = smov 0   ;;  %s1045_s19 = smov 0  }
   0xb LB: > { %s573_s20 = sadd.s32 4294967295, %s1005_s19   ;;  %p575_p0 = scmp.ge.s32.totalorder %s1005_s19, 1  ;;  %s1005_s19 = sphi %s1045_s19, %s20_s19   ;;  %s1001_s18 = sphi %s1043_s18, %s1235_s18   ;;  %s997_s17 = sphi %s1041_s17, %s1234_s17   ;;  %s993_s16 = sphi %s1039_s16, %s1233_s16   ;;  %s989_s15 = sphi %s1037_s15, %s1232_s15   ;;  %s985_s14 = sphi %s1035_s14, %s1231_s14   ;;  %s981_s13 = sphi %s1033_s13, %s1230_s13   ;;  %s977_s12 = sphi %s1031_s12, %s1229_s12  }
   0xc   : > { %p1075_p1 = scmp.eq.s32.totalorder %s573_s20, 0  ;;  %p135_p2 = scmp.lt.s32.totalorder %s1005_s19, 5 }
   0xd   : > { %s1218_s1 = sld [smem:[#allocation14_spill]]  ;;  %s1007_s26 = smov [#allocation5]  }
   0xe   : > { %p1083_p3 = pnand %p575_p0, %p135_p2  ;;  %s148_s27 = sshll.u32 %s1007_s26, 4  ;;  %s149_s27 = int_to_ptr.vmem [resolvable:$true] %s148_s27 }
   0xf   : > { %s1220_s2 = sld [smem:[#allocation15_spill]]  ;;  %s1008_s4 = smov 192  }
  0x10   : > { %p724_p4 = pneg %p1083_p3  ;;  %s1009_s5 = smov 12  }
  0x11   : > { %s1010_s6 = smov [#allocation7]   ;;  %s574_s8 = sadd.s32 4294967294, %s1005_s19  }
  0x12   : > { %p725_p5 = pnand %p724_p4, %p1075_p1  ;;  %s163_s7 = sshll.u32 %s1010_s6, 4  ;;  %s164_s7 = int_to_ptr.vmem [resolvable:$true] %s163_s7 }
  0x13   : > { %s146_s24 = sshll.u32 %s1218_s1, 4  ;;  %s29_s9 = sadd.s32 1, %s997_s17  ;;  %s147_s24 = int_to_ptr.hbm [resolvable:$true] %s146_s24 }
  0x14   : > { %727 = dma.hbm_to_vmem [thread:$0]  (!%p725_p5), %s147_s24, 3072, %s149_s27, [#allocation6], %s1008_s4, %s1008_s4, %s1009_s5  }
  0x15   : > { %s161_s30 = sshll.u32 %s1220_s2, 4  ;;  %p30_p6 = scmp.ge.s32.totalorder %s29_s9, 2  ;;  %s162_s30 = int_to_ptr.hbm [resolvable:$true] %s161_s30 }
  0x16   : > { %730 = dma.hbm_to_vmem [thread:$0]  (!%p725_p5), %s162_s30, 48, %s164_s7, [#allocation6]  }
  0x17   : > { %s32_s10 = sadd.s32 1, %s1001_s18  ;;  %s41_s11 = sadd.s32 1, %s985_s14 }
  0x18   : > { %p48_p7 = scmp.ne.s32.totalorder %s985_s14, %s981_s13  ;;  %s1237_s9 = smov (%p30_p6, %s29_s9), 0 }
  0x19   : > { %1221 = sst [smem:[#allocation12_spill]] %s1237_s9  ;;  %s1239_s10 = smov (!%p30_p6, %s32_s10), %s1001_s18 }
  0x1a   : > { %s37_s22 = ssub.s32 %s997_s17, %s1237_s9  ;;  %p49_p8 = scmp.eq.s32.totalorder %s1005_s19, 0 }
  0x1b   : > { %p34_p9 = scmp.ge.s32.totalorder %s1239_s10, 2  ;;  %p54_p10 = scmp.ne.s32.totalorder %s981_s13, %s977_s12 }
  0x1c   : > { %p1108_p11 = por %p49_p8, %p48_p7  ;;  %p122_p12 = scmp.eq.s32.totalorder %s573_s20, 3 }
  0x1d   : > { %s1241_s10 = smov (%p34_p9, %s1239_s10), 0  ;;  %p1118_p13 = por %p1075_p1, %p54_p10 }
  0x1e   : > { %1223 = sst [smem:[#allocation13_spill]] %s1241_s10  ;;  %p1122_p0 = por %p122_p12, %p48_p7 }
  0x1f   : > { %s36_s27 = ssub.s32 %s1001_s18, %s1241_s10  ;;  %p128_p2 = scmp.eq.s32.totalorder %s574_s8, 3 }
  0x20   : > { %s38_s28 = sor.u32 %s37_s22, %s36_s27  ;;  %p741_p4 = scmp.lt.s32.totalorder %s1005_s19, 4 }
  0x21   : > { %p39_p5 = scmp.eq.s32.totalorder %s38_s28, 0  ;;  %p1129_p6 = por %p128_p2, %p54_p10 }
  0x22   : > { %s174_s29 = sand.u32 1, %s985_s14   ;;  %s580_s30 = sshll.u32 %s1001_s18, 1 }
  0x23   : > { %s1136_s4 = scalar_select %p39_p5, %s985_s14, %s41_s11  }
  0x24   : > { %s579_s5 = sshll.u32 %s174_s29, 2  ;;  %s182_s6 = sadd.s32 %s997_s17, %s580_s30 }
  0x25   : > { %s581_s7 = sshll.u32 %s182_s6, 2  ;;  %s178_s1 = scalar_lea.vmem [#allocation2], %s579_s5 }
  0x26   : > { %s188_s2 = sshll.u32 %s178_s1, 4  ;;  %s184_s9 = scalar_lea.hbm %s1209_s0, %s581_s7  ;;  %s189_s2 = int_to_ptr.vmem [resolvable:$true] %s188_s2 }
  0x27   : > { %s186_s22 = sshll.u32 %s184_s9, 4  ;;  %p732_p7 = pnand %p741_p4, %p1108_p11  ;;  %s187_s22 = int_to_ptr.hbm [resolvable:$true] %s186_s22 }
  0x28   : > { %s175_s27 = scalar_lea.sflag [#allocation3], %s174_s29  ;;  %197 = sbr.rel (%p1083_p3) target bundleno = 224 (0xe0), region = 32 }
  0x29   : > { %734 = dma.hbm_to_vmem [thread:$0]  (!%p732_p7), %s187_s22, 64, %s189_s2, %s175_s27  }
  0x2a   : > { %s1149_s11 = sand.u32 (!%p1083_p3), 1, %s981_s13  }
  0x2b   : > { %s583_s1 = sshll.u32 (!%p1083_p3), %s1149_s11, 2  ;;  %s200_s10 = scalar_lea.sflag (!%p1083_p3), [#allocation3], %s1149_s11 }
  0x2c   : > { %s1153_s28 = scalar_lea.vmem (!%p1083_p3), [#allocation2], %s583_s1 }
  0x2d   : > { %964 = dma.done.wait (%p1118_p13), %s200_s10, 64  }
  0x2e   : > { %966 = vsyncadd (%p1118_p13), %s200_s10, 4294967232 }
  0x2f   : > { %968 = dma.done.wait (%p1075_p1), [#allocation6], 3120  }
  0x30   : > { %970 = vsyncadd (%p1075_p1), [#allocation6], 4294964176  ;;  %v672_v0 = vld [vmem:[#allocation5 + $0xa8] sm:$0xf]  ;;  %v707_v1 = vld [vmem:[#allocation5 + $0xb0] sm:$0xf0] }
  0x31   : > { %v706_v2 = vld [vmem:[#allocation5 + $0xac] sm:$0xf]  ;;  %v673_v3 = vor.u32 %v707_v1, %v672_v0  ;;  %v674_v4 = vld [vmem:[#allocation5 + $0xb4] sm:$0xf0]  ;;  %v680_v5 = vld [vmem:[#allocation5 + $0xb0] sm:$0xf] }
  0x32   : > { %v708_v6 = vld [vmem:[#allocation5 + $0xb8] sm:$0xf0]  ;;  %v677_v7 = vor.u32 %v706_v2, %v674_v4  ;;  %v660_v9 = vld [vmem:[#allocation5 + $0x90] sm:$0xf]  ;;  %v703_v11 = vld [vmem:[#allocation5 + $0x94] sm:$0xf] }
  0x33   : > { %v681_v8 = vor.u32 %v708_v6, %v680_v5  ;;  %v704_v10 = vld [vmem:[#allocation5 + $0x98] sm:$0xf0]  ;;  %406 = vmatpush.bf16.msra.mxu0 %v673_v3  ;;  %v662_v13 = vld [vmem:[#allocation5 + $0x9c] sm:$0xf0]  ;;  %v668_v14 = vld [vmem:[#allocation5 + $0x98] sm:$0xf] }
  0x34   : > { %v661_v12 = vor.u32 %v704_v10, %v660_v9  ;;  %v705_v15 = vld [vmem:[#allocation5 + $0xa0] sm:$0xf0]  ;;  %419 = vmatpush.bf16.msra.mxu1 %v677_v7  ;;  %v665_v16 = vor.u32 %v703_v11, %v662_v13  ;;  %v648_v18 = vld [vmem:[#allocation5 + $0x78] sm:$0xf]  ;;  %v700_v20 = vld [vmem:[#allocation5 + $0x7c] sm:$0xf] }
  0x35   : > { %432 = vmatpush.bf16.msra.mxu2 %v681_v8  ;;  %v669_v17 = vor.u32 %v705_v15, %v668_v14  ;;  %v701_v19 = vld [vmem:[#allocation5 + $0x80] sm:$0xf0]  ;;  %v650_v21 = vld [vmem:[#allocation5 + $0x84] sm:$0xf0]  ;;  %v656_v22 = vld [vmem:[#allocation5 + $0x80] sm:$0xf] }
  0x36   : > { %v702_v23 = vld [vmem:[#allocation5 + $0x88] sm:$0xf0]  ;;  %v649_v24 = vor.u32 %v701_v19, %v648_v18  ;;  %v653_v25 = vor.u32 %v700_v20, %v650_v21  ;;  %v636_v27 = vld [vmem:[#allocation5 + $0x60] sm:$0xf]  ;;  %v697_v29 = vld [vmem:[#allocation5 + $0x64] sm:$0xf] }
  0x37   : > { %407 = vmatpush.bf16.msra.mxu0 %v661_v12  ;;  %v657_v26 = vor.u32 %v702_v23, %v656_v22  ;;  %v698_v28 = vld [vmem:[#allocation5 + $0x68] sm:$0xf0]  ;;  %v638_v30 = vld [vmem:[#allocation5 + $0x6c] sm:$0xf0]  ;;  %v644_v31 = vld [vmem:[#allocation5 + $0x68] sm:$0xf] }
  0x38   : > { %420 = vmatpush.bf16.msra.mxu1 %v665_v16  ;;  %v699_v32 = vld [vmem:[#allocation5 + $0x70] sm:$0xf0]  ;;  %v637_v33 = vor.u32 %v698_v28, %v636_v27  ;;  %v641_v34 = vor.u32 %v697_v29, %v638_v30  ;;  %v624_v36 = vld [vmem:[#allocation5 + $0x48] sm:$0xf]  ;;  %v694_v38 = vld [vmem:[#allocation5 + $0x4c] sm:$0xf] }
  0x39   : > { %433 = vmatpush.bf16.msra.mxu2 %v669_v17  ;;  %v645_v35 = vor.u32 %v699_v32, %v644_v31  ;;  %v695_v37 = vld [vmem:[#allocation5 + $0x50] sm:$0xf0]  ;;  %v626_v39 = vld [vmem:[#allocation5 + $0x54] sm:$0xf0]  ;;  %v632_v40 = vld [vmem:[#allocation5 + $0x50] sm:$0xf] }
  0x3a   : > { %v696_v41 = vld [vmem:[#allocation5 + $0x58] sm:$0xf0]  ;;  %v625_v42 = vor.u32 %v695_v37, %v624_v36  ;;  %v629_v43 = vor.u32 %v694_v38, %v626_v39  ;;  %v612_v45 = vld [vmem:[#allocation5 + $0x30] sm:$0xf]  ;;  %v691_v47 = vld [vmem:[#allocation5 + $0x34] sm:$0xf] }
  0x3b   : > { %408 = vmatpush.bf16.msra.mxu0 %v649_v24  ;;  %v633_v44 = vor.u32 %v696_v41, %v632_v40  ;;  %v692_v46 = vld [vmem:[#allocation5 + $0x38] sm:$0xf0]  ;;  %v614_v48 = vld [vmem:[#allocation5 + $0x3c] sm:$0xf0]  ;;  %v620_v49 = vld [vmem:[#allocation5 + $0x38] sm:$0xf] }
  0x3c   : > { %421 = vmatpush.bf16.msra.mxu1 %v653_v25  ;;  %v693_v50 = vld [vmem:[#allocation5 + $0x40] sm:$0xf0]  ;;  %v613_v51 = vor.u32 %v692_v46, %v612_v45  ;;  %v617_v52 = vor.u32 %v691_v47, %v614_v48  ;;  %v600_v54 = vld [vmem:[#allocation5 + $0x18] sm:$0xf]  ;;  %v688_v56 = vld [vmem:[#allocation5 + $0x1c] sm:$0xf] }
  0x3d   : > { %434 = vmatpush.bf16.msra.mxu2 %v657_v26  ;;  %v621_v53 = vor.u32 %v693_v50, %v620_v49  ;;  %v689_v55 = vld [vmem:[#allocation5 + $0x20] sm:$0xf0]  ;;  %v602_v57 = vld [vmem:[#allocation5 + $0x24] sm:$0xf0]  ;;  %v608_v58 = vld [vmem:[#allocation5 + $0x20] sm:$0xf] }
  0x3e   : > { %v690_v59 = vld [vmem:[#allocation5 + $0x28] sm:$0xf0]  ;;  %v601_v60 = vor.u32 %v689_v55, %v600_v54  ;;  %v605_v61 = vor.u32 %v688_v56, %v602_v57  ;;  %v588_v63 = vld [vmem:[#allocation5] sm:$0xf]  ;;  %v685_v1 = vld [vmem:[#allocation5 + $0x4] sm:$0xf] }
  0x3f   : > { %409 = vmatpush.bf16.msra.mxu0 %v637_v33  ;;  %v609_v62 = vor.u32 %v690_v59, %v608_v58  ;;  %v686_v0 = vld [vmem:[#allocation5 + $0x8] sm:$0xf0]  ;;  %v590_v2 = vld [vmem:[#allocation5 + $0xc] sm:$0xf0]  ;;  %v596_v3 = vld [vmem:[#allocation5 + $0x8] sm:$0xf] }
  0x40   : > { %422 = vmatpush.bf16.msra.mxu1 %v641_v34  ;;  %v687_v4 = vld [vmem:[#allocation5 + $0x10] sm:$0xf0]  ;;  %v589_v5 = vor.u32 %v686_v0, %v588_v63  ;;  %v593_v6 = vor.u32 %v685_v1, %v590_v2  ;;  %v237_v8 = vld [vmem:[%s1153_s28] sm:$0xf]  ;;  %s710_s2 = smul.u32 3, %s989_s15  ;;  %s450_s6 = scalar_lea.sflag [#allocation4], %s1149_s11 }
  0x41   : > { %435 = vmatpush.bf16.msra.mxu2 %v645_v35  ;;  %v597_v7 = vor.u32 %v687_v4, %v596_v3  ;;  %v270_v9 = vld [vmem:[#allocation7] sm:$0x7]  ;;  %s711_s21 = smul.u32 6, %s993_s16  ;;  %s923_s1 = scalar_lea.hbm %s1212_s3, 48 }
  0x42   : > { %v272_v10 = vperm.slane %v270_v9, 0  ;;  %v273_v11 = vperm.slane %v270_v9, 1  ;;  %s709_s9 = smul.u32 12, %s1149_s11  ;;  %v274_v17 = vperm.slane %v270_v9, 2 }
  0x43   : > { %410 = vmatpush.bf16.msra.mxu0 %v625_v42  ;;  %s461_s25 = sadd.s32 %s711_s21, %s710_s2 }
  0x44   : > { %423 = vmatpush.bf16.msra.mxu1 %v629_v43  ;;  %s682_s23 = sshll.u32 %s461_s25, 2  ;;  %s236_s5 = scalar_lea.vmem [#allocation8], %s709_s9 }
  0x45   : > { %436 = vmatpush.bf16.msra.mxu2 %v633_v44  ;;  %s463_s30 = scalar_lea.hbm %s1212_s3, %s682_s23  ;;  %s465_s15 = sshll.u32 %s236_s5, 4  ;;  %s466_s15 = int_to_ptr.vmem [resolvable:$true] %s465_s15 }
  0x46   : > { %s467_s16 = sshll.u32 %s463_s30, 4  ;;  %s468_s16 = int_to_ptr.hbm [resolvable:$true] %s467_s16 }
  0x47   : > { %411 = vmatpush.bf16.msra.mxu0 %v613_v51  ;;  %s917_s7 = sshra.s32 %s468_s16, 4  ;;  %s918_s7 = int_to_ptr.hbm [resolvable:$true] %s917_s7 }
  0x48   : > { %424 = vmatpush.bf16.msra.mxu1 %v617_v52  ;;  %s919_s8 = scalar_lea.hbm %s918_s7, 12  ;;  %p924_p9 = scmp.lt.s32.totalorder %s918_s7, %s1212_s3 }
  0x49   : > { %437 = vmatpush.bf16.msra.mxu2 %v621_v53  ;;  %p920_p1 = scmp.ne.s32.totalorder %s918_s7, %s919_s8  ;;  %p925_p10 = scmp.lt.s32.totalorder %s923_s1, %s919_s8 }
  0x4b   : > { %412 = vmatpush.bf16.msra.mxu0 %v601_v60  ;;  %p921_p3 = pnand %p920_p1, %p1122_p0  ;;  %p926_p11 = por %p925_p10, %p924_p9 }
  0x4c   : > { %425 = vmatpush.bf16.msra.mxu1 %v605_v61 }
  0x4d   : > { %438 = vmatpush.bf16.msra.mxu2 %v609_v62  ;;  %p922_p8 = pneg %p921_p3 }
  0x4f   : > { %413 = vmatpush.bf16.msra.mxu0 %v589_v5  ;;  %p927_p12 = pnand %p926_p11, %p922_p8 }
  0x50   : > { %426 = vmatpush.bf16.msra.mxu1 %v593_v6 }
  0x51   : > { %439 = vmatpush.bf16.msra.mxu2 %v597_v7 }
  0x52   : > { %414 = vmatmul.bf16.vlgmr.msra.gmra.mxu0 %v237_v8 }
  0x53   : > { %427 = vmatmul.bf16.vlgmr.msra.gmra.mxu1 %v237_v8 }
  0x54   : > { %440 = vmatmul.bf16.vlgmr.msra.gmra.mxu2 %v237_v8 }
  0xcf   : > { %v415_v12 = vpop.f32.mrf.mxu0 }
  0xd0   : > { %v416_v13 = vadd.f32 %v415_v12, %v272_v10  ;;  %v428_v14 = vpop.f32.mrf.mxu1 }
  0xd1   : > { %v429_v15 = vadd.f32 %v428_v14, %v273_v11 }
  0xd3   : > { %v445_v16 = vpack.c.bf16 %v429_v15, %v416_v13 }
  0xd5   : > { %447 = vst [vmem:[%s236_s5] sm:$0xff] %v445_v16 }
  0xd7   : > { %v441_v18 = vpop.f32.mrf.mxu2  ;;  %v417_v20 = vpop.f32.mrf.mxu0 }
  0xd8   : > { %v442_v19 = vadd.f32 %v441_v18, %v274_v17  ;;  %v430_v21 = vpop.f32.mrf.mxu1 }
  0xda   : > { %v446_v22 = vpack.c.bf16 %v442_v19, %v442_v19 }
  0xdc   : > { %448 = vst [vmem:[%s236_s5 + $0x8] sm:$0xf] %v446_v22 }
  0xdd   : > { %930 = shalt.err (!%p927_p12)
}
  0xde   : > { %722 = dma.vmem_to_hbm [thread:$0]  (%p1122_p0), %s466_s15, 192, %s468_s16, %s450_s6  }
  0xdf   : > { %v443_v23 = vpop.f32.mrf.mxu2 }
  0xe0 PF: > { %p744_p13 = scmp.ge.s32.totalorder %s1005_s19, 2  ;;  %s479_s11 = sand.u32 1, %s977_s12  }
  0xe1   : > { %s480_s2 = scalar_lea.sflag [#allocation4], %s479_s11 }
  0xe2   : > { %p736_p2 = pnand %p744_p13, %p1129_p6 }
  0xe4   : > { %p737_p4 = pneg %p736_p2 }
  0xe6   : > { %972 = dma.done.wait (%p737_p4), %s480_s2, 192  }
  0xe7   : > { %974 = vsyncadd (%p737_p4), %s480_s2, 4294967104  ;;  %s20_s19 = sadd.s32 1, %s1005_s19   ;;  %s1227_s26 = sld [smem:[#allocation12_spill]] }
  0xe8   : > { %p17_p5 = scmp.ge.s32.totalorder %s20_s19, 6   ;;  %s1228_s21 = sld [smem:[#allocation13_spill]] }
  0xe9   : > { %s1229_s12 = smov %s981_s13  ;;  %s1230_s13 = smov %s985_s14 }
  0xea   : > { %s1231_s14 = smov %s1136_s4  ;;  %s1232_s15 = smov %s997_s17 }
  0xeb   : > { %s1233_s16 = smov %s1001_s18  ;;  %19 = sbr.rel (!%p17_p5) target bundleno = 11 (0xb), region = 85 }
  0xed   : > { %s1234_s17 = smov %s1227_s26 }
  0xee   : > { %s1235_s18 = smov %s1228_s21 }
  0xf0   :  { %486 = vsyncpa [#allocation3], 1 }
  0xf1   :  { %488 = vsyncpa [#allocation3 + $0x1], 1 }
  0xf2   :  { %489 = vsyncpa [#allocation6], 1 }
  0xf3   :  { %490 = vsyncpa [#allocation4], 1 }
  0xf4   :  { %492 = vsyncpa [#allocation4 + $0x1], 1 }

</bundles_post_ra>
